<compile_context>
chip_gen: v7x
topology: tpu7x:2x2x1
jax: 0.10.0
libtpu: 0.0.40
codegen_flags: <defaults>
</compile_context>

<pallas_src>
import jax
import jax.numpy as jnp
from jax.experimental import pallas as pl
from jax.experimental.pallas import tpu as pltpu

BN_EPS = 1e-5


def _vmem_capacity_bytes() -> int:
    """Physical per-core VMEM (128 MiB v5e/v6e, 64 MiB v7x); conservative fallback."""
    try:
        cap = int(pltpu.get_tpu_info().vmem_capacity_bytes)
        if cap > 0:
            return cap
    except Exception:
        pass
    return 64 * 1024 * 1024


def _params(*dims, vmem_limit):
    return pltpu.CompilerParams(dimension_semantics=dims,
                                vmem_limit_bytes=int(vmem_limit))


def _interp_matrix(n_out: int, n_in: int) -> jnp.ndarray:
    """Bilinear (align_corners=True) interpolation matrix, shape (n_out, n_in)."""
    if n_in == 1:
        return jnp.ones((n_out, 1), jnp.float32)
    if n_out == 1:  # avoid divide-by-zero; sample the first input position
        return jnp.zeros((1, n_in), jnp.float32).at[0, 0].set(1.0)
    i = jnp.arange(n_out, dtype=jnp.float32)
    src = i * (n_in - 1) / (n_out - 1)
    lo = jnp.clip(jnp.floor(src).astype(jnp.int32), 0, n_in - 2)
    frac = src - lo.astype(jnp.float32)
    M = jnp.zeros((n_out, n_in), jnp.float32)
    M = M.at[jnp.arange(n_out), lo].add(1.0 - frac)
    M = M.at[jnp.arange(n_out), lo + 1].add(frac)
    return M


def _pick_pixel_tile(p_img: int, bytes_per_pixel: int, budget_bytes: int) -> int:
    """Largest pixel tile (multiple of 128 that divides p_img, or the whole image)
    whose double-buffered tiles stay under `budget_bytes`; keeps tiles >= 512 so each
    per-channel strided DMA row stays in the efficient burst regime."""
    cap = max(512, budget_bytes // max(bytes_per_pixel, 1))
    if p_img <= cap:
        return p_img
    best = None
    t = 128
    while t <= cap:
        if p_img % t == 0:
            best = t
        t += 128
    if best is not None:
        return best
    # TODO(synk): p_img has no 128-multiple divisor <= cap; pad the pixel axis to a
    # multiple of 128 (zero pixels contribute nothing to the stats) instead of this
    # whole-image fallback.
    return p_img


# ---------- Kernel 1: bilinear upsample (one flat matmul) + fused BN-stats ----------
def _upsample_stats_kernel(xf_ref, k_ref, up_ref, s_ref, g_ref):
    up = jnp.dot(xf_ref[0], k_ref[...],
                 preferred_element_type=jnp.float32)                  # (C_in, tQ)
    up_ref[0] = up.astype(up_ref.dtype)
    # Per-(image, tile) BN-stat ingredients while the tile is in VMEM: channel pixel
    # sums and the C_in x C_in Gram matrix (MXU).  Reduced over (n, tile) in XLA.
    s_ref[0, 0] = jnp.sum(up, axis=1, keepdims=True)                  # (C_in, 1)
    g_ref[0, 0] = jnp.dot(up, up.T, preferred_element_type=jnp.float32)  # (C_in, C_in)


# ---------- Kernel 2: conv1x1 + BN(scale/shift) + ReLU, lane-dense flat I/O ----------
def _conv_bn_relu_kernel(x_ref, w_ref, scale_ref, shift_ref, o_ref):
    y = jnp.dot(w_ref[...], x_ref[0], preferred_element_type=jnp.float32)  # (C_out, tP)
    y = y * scale_ref[...] + shift_ref[...]
    o_ref[0] = jnp.maximum(y, 0.0).astype(o_ref.dtype)


def upsample_interpolate(x, conv_w, gamma, beta, scale=2):
    """x: (N, C_in, H, W) f32; conv_w: (C_out, C_in); gamma/beta: (C_out,).

    Returns (x_up, conv_out) matching the PyTorch module's forward (training-mode BN).
    """
    N, C_in, H, W = x.shape
    C_out = conv_w.shape[0]
    Ho, Wo = H * scale, W * scale
    P = Ho * Wo
    HW = H * W

    vmem_cap = _vmem_capacity_bytes()
    vmem_limit = (vmem_cap * 3) // 4      # ~96 MiB on v5e/v6e, ~48 MiB on v7x
    tile_budget = vmem_cap // 4           # ~32 MiB on v5e/v6e, ~16 MiB on v7x

    Mh = _interp_matrix(Ho, H)
    Mw = _interp_matrix(Wo, W)

    x_flat_in = x.reshape(N, C_in, HW)    # free row-major view of the NCHW input

    # Kronecker path is the win for small/moderate feature maps (test case: 16x16).
    # Gate it so the per-image K read never dominates the x_up write traffic.
    kron_bytes = HW * P * 4
    use_kron = kron_bytes <= max(8 * 1024 * 1024, 2 * C_in * P * 4)

    if use_kron:
        # up_flat[c, o*Wo+p] = sum_{h,w} x[c,h,w] * Mh[o,h] * Mw[p,w]  ==  x_flat @ K
        K = jnp.kron(Mh, Mw).T                                     # (H*W, Ho*Wo)
        tQ = _pick_pixel_tile(P, (HW + C_in) * 4 * 2, tile_budget)
        nQ = P // tQ
        up_flat, s_parts, g_parts = pl.pallas_call(
            _upsample_stats_kernel,
            out_shape=(jax.ShapeDtypeStruct((N, C_in, P), x.dtype),
                       jax.ShapeDtypeStruct((N, nQ, C_in, 1), jnp.float32),
                       jax.ShapeDtypeStruct((N, nQ, C_in, C_in), jnp.float32)),
            grid=(N, nQ),
            in_specs=[
                pl.BlockSpec((1, C_in, HW), lambda n, q: (n, 0, 0)),
                pl.BlockSpec((HW, tQ), lambda n, q: (0, q)),
            ],
            out_specs=(
                pl.BlockSpec((1, C_in, tQ), lambda n, q: (n, 0, q)),
                pl.BlockSpec((1, 1, C_in, 1), lambda n, q: (n, q, 0, 0)),
                pl.BlockSpec((1, 1, C_in, C_in), lambda n, q: (n, q, 0, 0)),
            ),
            compiler_params=_params("parallel", "parallel", vmem_limit=vmem_limit),
        )(x_flat_in, K)
        s = jnp.sum(s_parts, axis=(0, 1))                          # (C_in, 1)
        G = jnp.sum(g_parts, axis=(0, 1))                          # (C_in, C_in)
    else:
        # TODO(synk): large feature maps need a separable row-tiled Pallas upsample
        # kernel (H-axis contraction + flat W-axis matmul with bounded VMEM blocks);
        # until then fall back to XLA for the upsample + stat ingredients, keeping the
        # heavy conv/BN/ReLU pass in Pallas.
        up4 = jnp.einsum('oh,nchw,pw->ncop', Mh, x, Mw).astype(x.dtype)
        up_flat = up4.reshape(N, C_in, P)
        upf32 = up_flat.astype(jnp.float32)
        s = jnp.sum(upf32, axis=(0, 2)).reshape(C_in, 1)
        G = jnp.einsum('ncp,nkp->ck', upf32, upf32)

    x_up = up_flat.reshape(N, C_in, Ho, Wo)                        # free view back to NCHW

    # BN batch statistics of y = W @ x_up from the fused ingredients (no extra pass):
    #   sum_y = W s ;  ssq_y = diag(W G W^T) = rowsum((W G) * W)
    w32 = conv_w.astype(jnp.float32)
    sum_y = w32 @ s                                                # (C_out, 1)
    ssq_y = jnp.sum((w32 @ G) * w32, axis=1, keepdims=True)        # (C_out, 1)
    inv_count = 1.0 / float(N * P)
    mean = sum_y * inv_count
    var = jnp.maximum(ssq_y * inv_count - mean * mean, 0.0)        # biased batch variance
    inv_std = jax.lax.rsqrt(var + BN_EPS)
    scale_v = gamma.reshape(C_out, 1).astype(jnp.float32) * inv_std
    shift_v = beta.reshape(C_out, 1).astype(jnp.float32) - mean * scale_v
    # TODO(synk): BatchNorm running_mean/running_var are not updated (training-mode
    # normalization only); the PyTorch module is stateful there.

    # Conv1x1 + BN + ReLU: lane-dense flat in/out, both grid axes parallel.
    tP = _pick_pixel_tile(P, (C_in + C_out) * 4 * 2, tile_budget)
    nP = P // tP
    y_flat = pl.pallas_call(
        _conv_bn_relu_kernel,
        out_shape=jax.ShapeDtypeStruct((N, C_out, P), x.dtype),
        grid=(N, nP),
        in_specs=[
            pl.BlockSpec((1, C_in, tP), lambda n, p: (n, 0, p)),
            pl.BlockSpec((C_out, C_in), lambda n, p: (0, 0)),
            pl.BlockSpec((C_out, 1), lambda n, p: (0, 0)),
            pl.BlockSpec((C_out, 1), lambda n, p: (0, 0)),
        ],
        out_specs=pl.BlockSpec((1, C_out, tP), lambda n, p: (n, 0, p)),
        compiler_params=_params("parallel", "parallel", vmem_limit=vmem_limit),
    )(up_flat, conv_w, scale_v, shift_v)

    conv_out = y_flat.reshape(N, C_out, Ho, Wo)                    # free view back to NCHW
    return x_up, conv_out


if __name__ == "__main__":
    # TODO(synk): only kernel_size=1 / padding=0 (the module's defaults) are supported;
    # a general KxK conv would need an im2col or halo-exchange kernel.
    key = jax.random.PRNGKey(0)
    kx, kw = jax.random.split(key)

    N, C_in, C_out, H, W = 2, 4, 8, 16, 16
    x = jax.random.normal(kx, (N, C_in, H, W), dtype=jnp.float32)
    conv_w = (jax.random.normal(kw, (C_out, C_in), dtype=jnp.float32)
              * (1.0 / jnp.sqrt(C_in)))
    gamma = jnp.ones((C_out,), jnp.float32)
    beta = jnp.zeros((C_out,), jnp.float32)

    fwd = jax.jit(upsample_interpolate, static_argnums=(4,))
    x_up, conv_out = fwd(x, conv_w, gamma, beta, 2)
    jax.block_until_ready((x_up, conv_out))

    assert x_up.shape == (N, C_in, 2 * H, 2 * W)
    assert conv_out.shape == (N, C_out, 2 * H, 2 * W)
    assert bool(jnp.all(jnp.isfinite(x_up))) and bool(jnp.all(jnp.isfinite(conv_out)))
    assert bool(jnp.all(conv_out >= 0.0))                           # ReLU applied

    # Pure-JAX reference of the same math (loose tol: default MXU f32 matmul precision).
    Mh = _interp_matrix(2 * H, H)
    Mw = _interp_matrix(2 * W, W)
    x_up_ref = jnp.einsum('oh,nchw,pw->ncop', Mh, x, Mw)
    y_ref = jnp.einsum('oc,nchw->nohw', conv_w, x_up_ref)
    mu = y_ref.mean(axis=(0, 2, 3), keepdims=True)
    vr = jnp.square(y_ref - mu).mean(axis=(0, 2, 3), keepdims=True)
    ref = jnp.maximum((y_ref - mu) * jax.lax.rsqrt(vr + BN_EPS)
                      * gamma.reshape(1, -1, 1, 1) + beta.reshape(1, -1, 1, 1), 0.0)
    assert bool(jnp.allclose(x_up, x_up_ref, rtol=2e-2, atol=2e-2))
    assert bool(jnp.allclose(conv_out, ref, rtol=2e-2, atol=2e-2))

    print("KERNEL_OK")
</pallas_src>

<mosaic_0001>
module attributes {stable_mosaic.version = 11 : i64} {
  func.func private @main(%arg0: i32) attributes {dimension_semantics = [#tpu.dimension_semantics<core_parallel>], iteration_bounds = array<i64: 2>, tpu.core_type = #tpu.core_type<sc_scalar_subcore>, window_params = []} {
    return
  }
}

module attributes {stable_mosaic.version = 11 : i64} {
  func.func private @main(%arg0: i32) attributes {dimension_semantics = [#tpu.dimension_semantics<core_parallel>], iteration_bounds = array<i64: 2>, tpu.core_type = #tpu.core_type<sc_scalar_subcore>, window_params = []} {
    return
  }
}

module attributes {stable_mosaic.version = 11 : i64} {
  func.func @_upsample_stats_kernel(%arg0: i32, %arg1: i32, %arg2: memref<1x4x256xf32, #tpu.memory_space<vmem>>, %arg3: memref<256x1024xf32, #tpu.memory_space<vmem>>, %arg4: memref<1x4x1024xf32, #tpu.memory_space<vmem>>, %arg5: memref<1x1x4x1xf32, #tpu.memory_space<vmem>>, %arg6: memref<1x1x4x4xf32, #tpu.memory_space<vmem>>) attributes {dimension_semantics = [#tpu.dimension_semantics<parallel>, #tpu.dimension_semantics<parallel>], iteration_bounds = array<i64: 2, 1>, scalar_prefetch = 0 : i64, scratch_operands = 0 : i64, tpu.core_type = #tpu.core_type<tc>, window_params = [{transform_indices = @transform_0, window_bounds = array<i64: 1, 4, 256>}, {transform_indices = @transform_1, window_bounds = array<i64: 256, 1024>}, {transform_indices = @transform_2, window_bounds = array<i64: 1, 4, 1024>}, {transform_indices = @transform_3, window_bounds = array<i64: 1, 1, 4, 1>}, {transform_indices = @transform_4, window_bounds = array<i64: 1, 1, 4, 4>}]} {
    %c0 = arith.constant 0 : index
    %c0_0 = arith.constant 0 : index
    %c0_1 = arith.constant 0 : index
    %0 = vector.load %arg2[%c0, %c0_0, %c0_1] : memref<1x4x256xf32, #tpu.memory_space<vmem>>, vector<1x4x256xf32>
    %1 = vector.shape_cast %0 : vector<1x4x256xf32> to vector<4x256xf32>
    %c0_2 = arith.constant 0 : index
    %c0_3 = arith.constant 0 : index
    %2 = vector.load %arg3[%c0_2, %c0_3] : memref<256x1024xf32, #tpu.memory_space<vmem>>, vector<256x1024xf32>
    %cst = arith.constant dense<0.000000e+00> : vector<4x1024xf32>
    %3 = tpu.matmul %1, %2, %cst {dimension_numbers = #tpu.dot_dimension_numbers<[1], [0], [0], [1], [0, 0, 1, 1], [], []>} : vector<4x256xf32>, vector<256x1024xf32>, vector<4x1024xf32> -> vector<4x1024xf32>
    %c0_4 = arith.constant 0 : index
    %c0_5 = arith.constant 0 : index
    %c0_6 = arith.constant 0 : index
    %4 = vector.load %arg4[%c0_4, %c0_5, %c0_6] : memref<1x4x1024xf32, #tpu.memory_space<vmem>>, vector<1x4x1024xf32>
    %5 = vector.shape_cast %4 : vector<1x4x1024xf32> to vector<4x1024xf32>
    %6 = vector.shape_cast %3 : vector<4x1024xf32> to vector<1x4x1024xf32>
    tpu.vector_store %arg4[%c0_4, %c0_5, %c0_6], %6 {strides = array<i32>} : memref<1x4x1024xf32, #tpu.memory_space<vmem>>, vector<1x4x1024xf32>,
    %cst_7 = arith.constant dense<0.000000e+00> : vector<4xf32>
    %7 = vector.multi_reduction <add>, %3, %cst_7 [1] : vector<4x1024xf32> to vector<4xf32>
    %8 = vector.shape_cast %7 : vector<4xf32> to vector<4x1xf32>
    %c0_8 = arith.constant 0 : index
    %c0_9 = arith.constant 0 : index
    %c0_10 = arith.constant 0 : index
    %c0_11 = arith.constant 0 : index
    %9 = vector.load %arg5[%c0_8, %c0_9, %c0_10, %c0_11] : memref<1x1x4x1xf32, #tpu.memory_space<vmem>>, vector<1x1x4x1xf32>
    %10 = vector.shape_cast %9 : vector<1x1x4x1xf32> to vector<4x1xf32>
    %11 = vector.shape_cast %8 : vector<4x1xf32> to vector<1x1x4x1xf32>
    tpu.vector_store %arg5[%c0_8, %c0_9, %c0_10, %c0_11], %11 {strides = array<i32>} : memref<1x1x4x1xf32, #tpu.memory_space<vmem>>, vector<1x1x4x1xf32>,
    %12 = tpu.transpose %3, [1, 0] : vector<4x1024xf32> -> vector<1024x4xf32>
    %cst_12 = arith.constant dense<0.000000e+00> : vector<4x4xf32>
    %13 = tpu.matmul %3, %12, %cst_12 {dimension_numbers = #tpu.dot_dimension_numbers<[1], [0], [0], [1], [0, 0, 1, 1], [], []>} : vector<4x1024xf32>, vector<1024x4xf32>, vector<4x4xf32> -> vector<4x4xf32>
    %c0_13 = arith.constant 0 : index
    %c0_14 = arith.constant 0 : index
    %c0_15 = arith.constant 0 : index
    %c0_16 = arith.constant 0 : index
    %14 = vector.load %arg6[%c0_13, %c0_14, %c0_15, %c0_16] : memref<1x1x4x4xf32, #tpu.memory_space<vmem>>, vector<1x1x4x4xf32>
    %15 = vector.shape_cast %14 : vector<1x1x4x4xf32> to vector<4x4xf32>
    %16 = vector.shape_cast %13 : vector<4x4xf32> to vector<1x1x4x4xf32>
    tpu.vector_store %arg6[%c0_13, %c0_14, %c0_15, %c0_16], %16 {strides = array<i32>} : memref<1x1x4x4xf32, #tpu.memory_space<vmem>>, vector<1x1x4x4xf32>,
    return
  }
  func.func @transform_0(%arg0: i32, %arg1: i32) -> (i32, i32, i32) {
    %c0_i32 = arith.constant 0 : i32
    %c0_i32_0 = arith.constant 0 : i32
    %c0_i32_1 = arith.constant 0 : i32
    return %arg0, %c0_i32, %c0_i32_0 : i32, i32, i32
  }
  func.func @transform_1(%arg0: i32, %arg1: i32) -> (i32, i32) {
    %c0_i32 = arith.constant 0 : i32
    %c0_i32_0 = arith.constant 0 : i32
    return %c0_i32, %arg1 : i32, i32
  }
  func.func @transform_2(%arg0: i32, %arg1: i32) -> (i32, i32, i32) {
    %c0_i32 = arith.constant 0 : i32
    %c0_i32_0 = arith.constant 0 : i32
    return %arg0, %c0_i32, %arg1 : i32, i32, i32
  }
  func.func @transform_3(%arg0: i32, %arg1: i32) -> (i32, i32, i32, i32) {
    %c0_i32 = arith.constant 0 : i32
    %c0_i32_0 = arith.constant 0 : i32
    %c0_i32_1 = arith.constant 0 : i32
    return %arg0, %arg1, %c0_i32, %c0_i32_0 : i32, i32, i32, i32
  }
  func.func @transform_4(%arg0: i32, %arg1: i32) -> (i32, i32, i32, i32) {
    %c0_i32 = arith.constant 0 : i32
    %c0_i32_0 = arith.constant 0 : i32
    %c0_i32_1 = arith.constant 0 : i32
    return %arg0, %arg1, %c0_i32, %c0_i32_0 : i32, i32, i32, i32
  }
}

module attributes {stable_mosaic.version = 11 : i64} {
  func.func @_conv_bn_relu_kernel(%arg0: i32, %arg1: i32, %arg2: memref<1x4x1024xf32, #tpu.memory_space<vmem>>, %arg3: memref<8x4xf32, #tpu.memory_space<vmem>>, %arg4: memref<8x1xf32, #tpu.memory_space<vmem>>, %arg5: memref<8x1xf32, #tpu.memory_space<vmem>>, %arg6: memref<1x8x1024xf32, #tpu.memory_space<vmem>>) attributes {dimension_semantics = [#tpu.dimension_semantics<parallel>, #tpu.dimension_semantics<parallel>], iteration_bounds = array<i64: 2, 1>, scalar_prefetch = 0 : i64, scratch_operands = 0 : i64, tpu.core_type = #tpu.core_type<tc>, window_params = [{transform_indices = @transform_0, window_bounds = array<i64: 1, 4, 1024>}, {pipeline_mode = #tpu.pipeline_mode<synchronous>, transform_indices = @transform_1, window_bounds = array<i64: 8, 4>}, {pipeline_mode = #tpu.pipeline_mode<synchronous>, transform_indices = @transform_2, window_bounds = array<i64: 8, 1>}, {pipeline_mode = #tpu.pipeline_mode<synchronous>, transform_indices = @transform_3, window_bounds = array<i64: 8, 1>}, {transform_indices = @transform_4, window_bounds = array<i64: 1, 8, 1024>}]} {
    %c0 = arith.constant 0 : index
    %c0_0 = arith.constant 0 : index
    %0 = vector.load %arg3[%c0, %c0_0] : memref<8x4xf32, #tpu.memory_space<vmem>>, vector<8x4xf32>
    %c0_1 = arith.constant 0 : index
    %c0_2 = arith.constant 0 : index
    %c0_3 = arith.constant 0 : index
    %1 = vector.load %arg2[%c0_1, %c0_2, %c0_3] : memref<1x4x1024xf32, #tpu.memory_space<vmem>>, vector<1x4x1024xf32>
    %2 = vector.shape_cast %1 : vector<1x4x1024xf32> to vector<4x1024xf32>
    %cst = arith.constant dense<0.000000e+00> : vector<8x1024xf32>
    %3 = tpu.matmul %0, %2, %cst {dimension_numbers = #tpu.dot_dimension_numbers<[1], [0], [0], [1], [0, 0, 1, 1], [], []>} : vector<8x4xf32>, vector<4x1024xf32>, vector<8x1024xf32> -> vector<8x1024xf32>
    %c0_4 = arith.constant 0 : index
    %c0_5 = arith.constant 0 : index
    %4 = vector.load %arg4[%c0_4, %c0_5] : memref<8x1xf32, #tpu.memory_space<vmem>>, vector<8x1xf32>
    %5 = vector.broadcast %4 : vector<8x1xf32> to vector<8x1024xf32>
    %6 = arith.mulf %3, %5 : vector<8x1024xf32>
    %c0_6 = arith.constant 0 : index
    %c0_7 = arith.constant 0 : index
    %7 = vector.load %arg5[%c0_6, %c0_7] : memref<8x1xf32, #tpu.memory_space<vmem>>, vector<8x1xf32>
    %8 = vector.broadcast %7 : vector<8x1xf32> to vector<8x1024xf32>
    %9 = arith.addf %6, %8 : vector<8x1024xf32>
    %cst_8 = arith.constant 0.000000e+00 : f32
    %10 = vector.broadcast %cst_8 : f32 to vector<8x1024xf32>
    %11 = arith.maximumf %9, %10 : vector<8x1024xf32>
    %c0_9 = arith.constant 0 : index
    %c0_10 = arith.constant 0 : index
    %c0_11 = arith.constant 0 : index
    %12 = vector.load %arg6[%c0_9, %c0_10, %c0_11] : memref<1x8x1024xf32, #tpu.memory_space<vmem>>, vector<1x8x1024xf32>
    %13 = vector.shape_cast %12 : vector<1x8x1024xf32> to vector<8x1024xf32>
    %14 = vector.shape_cast %11 : vector<8x1024xf32> to vector<1x8x1024xf32>
    tpu.vector_store %arg6[%c0_9, %c0_10, %c0_11], %14 {strides = array<i32>} : memref<1x8x1024xf32, #tpu.memory_space<vmem>>, vector<1x8x1024xf32>,
    return
  }
  func.func @transform_0(%arg0: i32, %arg1: i32) -> (i32, i32, i32) {
    %c0_i32 = arith.constant 0 : i32
    %c0_i32_0 = arith.constant 0 : i32
    return %arg0, %c0_i32, %arg1 : i32, i32, i32
  }
  func.func @transform_1(%arg0: i32, %arg1: i32) -> (i32, i32) {
    %c0_i32 = arith.constant 0 : i32
    %c0_i32_0 = arith.constant 0 : i32
    %c0_i32_1 = arith.constant 0 : i32
    return %c0_i32, %c0_i32_0 : i32, i32
  }
  func.func @transform_2(%arg0: i32, %arg1: i32) -> (i32, i32) {
    %c0_i32 = arith.constant 0 : i32
    %c0_i32_0 = arith.constant 0 : i32
    %c0_i32_1 = arith.constant 0 : i32
    return %c0_i32, %c0_i32_0 : i32, i32
  }
  func.func @transform_3(%arg0: i32, %arg1: i32) -> (i32, i32) {
    %c0_i32 = arith.constant 0 : i32
    %c0_i32_0 = arith.constant 0 : i32
    %c0_i32_1 = arith.constant 0 : i32
    return %c0_i32, %c0_i32_0 : i32, i32
  }
  func.func @transform_4(%arg0: i32, %arg1: i32) -> (i32, i32, i32) {
    %c0_i32 = arith.constant 0 : i32
    %c0_i32_0 = arith.constant 0 : i32
    return %arg0, %c0_i32, %arg1 : i32, i32, i32
  }
}

</mosaic_0001>

<bundles_post_ra>
// kernel: upsample_interpolate.3
= control target key start
LH: loop header
LB: loop body
LE: loop exit
PB: predicated region body
PF: predicated region fallthrough
CT: control target
= control target key end

     0   :  { %s793_s15 = smov 0   ;;  %s795_s16 = smov 0   ;;  %s851_s0 = inlined_call_operand.vmem [shape: f32[2,4,1024], index: 0, kind: input, shape index: {}]   ;;  %s852_s1 = inlined_call_operand.vmem [shape: f32[8,4], index: 1, kind: input, shape index: {}]   ;;  %s853_s2 = inlined_call_operand.vmem [shape: f32[8,1], index: 2, kind: input, shape index: {}]   ;;  %s854_s3 = inlined_call_operand.vmem [shape: f32[8,1], index: 3, kind: input, shape index: {}]   ;;  %s855_s4 = inlined_call_operand.vmem [shape: f32[2,8,1024], index: 4, kind: output, shape index: {}]  }
   0x1   :  { %s797_s17 = smov 0  }
   0x2 LB: > { %s26_s18 = sadd.s32 1, %s760_s16  ;;  %p690_p0 = scmp.ge.s32.totalorder %s764_s17, 1  ;;  %s764_s17 = sphi %s797_s17, %s14_s17   ;;  %s760_s16 = sphi %s795_s16, %s857_s16   ;;  %s756_s15 = sphi %s793_s15, %s856_s15  }
   0x3   : > { %p28_p1 = scmp.ge.s32.totalorder %s26_s18, 2  ;;  %p183_p2 = scmp.lt.s32.totalorder %s764_s17, 3 }
   0x5   : > { %s859_s18 = smov (%p28_p1, %s26_s18), 0  ;;  %p184_p3 = pnand %p690_p0, %p183_p2 }
   0x6   : > { %p218_p4 = scmp.lt.s32.totalorder (!%p184_p3), %s756_s15, 1  ;;  %v766_v0 = vmov (!%p184_p3), 0.0   ;;  %v555_v1 = vld [vmem:[%s853_s2] sm:$0xff] (!%p184_p3)  ;;  %v767_v2 = vmov (!%p184_p3), 0   ;;  %vm254_vm0 = vcmask (!%p184_p3), 1043456   ;;  %vm250_vm1 = vcmask (!%p184_p3), 31744  }
   0x7   : > { %187 = sbr.rel (%p184_p3) target bundleno = 246 (0xf6), region = 36  ;;  %335 = vmatprep.mubr.f32.mxu0 (!%p184_p3), %v766_v0  ;;  %406 = vmatprep.mubr.f32.mxu1 (!%p184_p3), %v766_v0  ;;  %v569_v3 = vld [vmem:[%s854_s3] sm:$0xff] (!%p184_p3) }
   0x8   : > { %737 = vset.pattern.permute.xlu0 (!%p184_p3), %v767_v2  ;;  %v237_v10 = vld [vmem:[%s852_s1] sm:$0xff] (!%p184_p3) }
   0x9   : > { %558 = vperm.xlu0 (!%p184_p3), %737, %v555_v1  }
   0xd   : > { %572 = vperm.xlu0 (!%p184_p3), %737, %v569_v3  }
   0xe   : > { %s861_s15 = smov (!%p218_p4, %s756_s15), 1 }
   0xf   : > { %s709_s21 = sshll.u32 %s861_s15, 5  ;;  %s710_s29 = sshll.u32 %s861_s15, 6 }
  0x10   : > { %s225_s26 = scalar_lea.vmem %s851_s0, %s709_s21  ;;  %s235_s6 = scalar_lea.vmem %s855_s4, %s710_s29 }
  0x11   : > { %v238_v4 = vld [vmem:[%s225_s26] sm:$0xff]  ;;  %v239_v5 = vld [vmem:[%s225_s26 + $0x8] sm:$0xff]  ;;  %v240_v6 = vld [vmem:[%s225_s26 + $0x10] sm:$0xff] }
  0x12   : > { %v246_v7 = vcombine.high %v238_v4, %v238_v4  ;;  %v247_v8 = vcombine.high %v239_v5, %v239_v5  ;;  %v241_v9 = vld [vmem:[%s225_s26 + $0x18] sm:$0xff]  ;;  %v248_v11 = vcombine.high %v240_v6, %v240_v6 }
  0x13   : > { %v249_v12 = vcombine.high %v241_v9, %v241_v9 }
  0x14   : > { %695 = vmatprep.subr.msk.mxu0 %vm254_vm0, %v246_v7  ;;  %698 = vmatprep.subr.msk.mxu1 %vm254_vm0, %v247_v8 }
  0x15   : > { %696 = vmatpush1.msk.msra.mxu0 %vm254_vm0, %v238_v4  ;;  %699 = vmatpush1.msk.msra.mxu1 %vm254_vm0, %v239_v5 }
  0x16   : > { %697 = vmatmul.mubr.msk.f32.vlgmr.msra.gmra.mrb[0].mxu0 %vm250_vm1, %v237_v10  ;;  %700 = vmatmul.mubr.msk.f32.vlgmr.msra.gmra.mrb[0].mxu1 %vm250_vm1, %v237_v10 }
  0x17   : > { %701 = vmatprep.subr.msk.mxu0 %vm254_vm0, %v248_v11  ;;  %704 = vmatprep.subr.msk.mxu1 %vm254_vm0, %v249_v12 }
  0x18   : > { %702 = vmatpush1.msk.msra.mxu0 %vm254_vm0, %v240_v6  ;;  %705 = vmatpush1.msk.msra.mxu1 %vm254_vm0, %v241_v9 }
  0x19   : > { %477 = vmatprep.mubr.f32.mxu0 %v766_v0  ;;  %548 = vmatprep.mubr.f32.mxu1 %v766_v0 }
  0x1a   : > { %703 = vmatmul.mubr.msk.f32.vlgmr.msra.gmra.mrb[2].mxu0 %vm250_vm1, %v237_v10  ;;  %706 = vmatmul.mubr.msk.f32.vlgmr.msra.gmra.mrb[2].mxu1 %vm250_vm1, %v237_v10 }
  0x88   : > { %v559_v13 = vpop.permute.xlu0 %558 }
  0x8c   : > { %v573_v14 = vpop.permute.xlu0 %572 }
  0xe9   : > { %v337_v15 = vpop.f32.mrb[0].mxu0  ;;  %v408_v16 = vpop.f32.mrb[0].mxu1 }
  0xea   : > { %v561_v17 = vmul.f32 %v559_v13, %v337_v15  ;;  %v563_v18 = vmul.f32 %v559_v13, %v408_v16  ;;  %v339_v19 = vpop.f32.mrb[1].mxu0  ;;  %v410_v20 = vpop.f32.mrb[1].mxu1 }
  0xeb   : > { %v562_v21 = vmul.f32 %v559_v13, %v339_v19  ;;  %v564_v22 = vmul.f32 %v559_v13, %v410_v20 }
  0xec   : > { %v575_v23 = vadd.f32 %v573_v14, %v561_v17  ;;  %v577_v24 = vadd.f32 %v573_v14, %v563_v18 }
  0xed   : > { %v576_v25 = vadd.f32 %v573_v14, %v562_v21  ;;  %v578_v26 = vadd.f32 %v573_v14, %v564_v22  ;;  %v479_v27 = vpop.f32.mrb[2].mxu0  ;;  %v550_v28 = vpop.f32.mrb[2].mxu1 }
  0xee   : > { %v583_v29 = vmax.f32 %v575_v23, 0.0  ;;  %v585_v30 = vmax.f32 %v577_v24, 0.0  ;;  %v565_v31 = vmul.f32 %v559_v13, %v479_v27  ;;  %v567_v32 = vmul.f32 %v559_v13, %v550_v28  ;;  %v481_v33 = vpop.f32.mrb[3].mxu0  ;;  %v552_v34 = vpop.f32.mrb[3].mxu1 }
  0xef   : > { %v584_v35 = vmax.f32 %v576_v25, 0.0  ;;  %v586_v36 = vmax.f32 %v578_v26, 0.0  ;;  %v566_v37 = vmul.f32 %v559_v13, %v481_v33  ;;  %v568_v38 = vmul.f32 %v559_v13, %v552_v34 }
  0xf0   : > { %591 = vst [vmem:[%s235_s6] sm:$0xff] %v583_v29  ;;  %593 = vst [vmem:[%s235_s6 + $0x10] sm:$0xff] %v585_v30  ;;  %v579_v39 = vadd.f32 %v573_v14, %v565_v31  ;;  %v581_v40 = vadd.f32 %v573_v14, %v567_v32 }
  0xf1   : > { %592 = vst [vmem:[%s235_s6 + $0x8] sm:$0xff] %v584_v35  ;;  %594 = vst [vmem:[%s235_s6 + $0x18] sm:$0xff] %v586_v36  ;;  %v580_v41 = vadd.f32 %v573_v14, %v566_v37  ;;  %v582_v42 = vadd.f32 %v573_v14, %v568_v38 }
  0xf2   : > { %v587_v43 = vmax.f32 %v579_v39, 0.0  ;;  %v589_v44 = vmax.f32 %v581_v40, 0.0 }
  0xf3   : > { %v588_v45 = vmax.f32 %v580_v41, 0.0  ;;  %v590_v46 = vmax.f32 %v582_v42, 0.0 }
  0xf4   : > { %595 = vst [vmem:[%s235_s6 + $0x20] sm:$0xff] %v587_v43  ;;  %597 = vst [vmem:[%s235_s6 + $0x30] sm:$0xff] %v589_v44 }
  0xf5   : > { %596 = vst [vmem:[%s235_s6 + $0x28] sm:$0xff] %v588_v45  ;;  %598 = vst [vmem:[%s235_s6 + $0x38] sm:$0xff] %v590_v46 }
  0xf6 PF: > { %s14_s17 = sadd.s32 1, %s764_s17   ;;  %s856_s15 = smov %s760_s16 }
  0xf7   : > { %p11_p5 = scmp.ge.s32.totalorder %s14_s17, 4   ;;  %s857_s16 = smov %s859_s18 }
  0xf9   :  { %13 = sbr.rel (!%p11_p5) target bundleno = 2 (0x2), region = 66 }

// kernel: upsample_interpolate.2
= control target key start
LH: loop header
LB: loop body
LE: loop exit
PB: predicated region body
PF: predicated region fallthrough
CT: control target
= control target key end

     0   :  { %s1675_s15 = smov 0   ;;  %s1677_s16 = smov 0   ;;  %s2521_s0 = inlined_call_operand.vmem [shape: f32[2,4,256], index: 0, kind: input, shape index: {}]   ;;  %s2522_s1 = inlined_call_operand.vmem [shape: f32[256,1024], index: 1, kind: input, shape index: {}]   ;;  %s2523_s2 = inlined_call_operand.vmem [shape: f32[2,4,1024], index: 2, kind: output, shape index: {0}]   ;;  %s2524_s3 = inlined_call_operand.vmem [shape: f32[2,1,4,1], index: 3, kind: output, shape index: {1}]   ;;  %s2525_s4 = inlined_call_operand.vmem [shape: f32[2,1,4,4], index: 4, kind: output, shape index: {2}]  }
   0x1   :  { %s1679_s17 = smov 0  }
   0x2 LB: > { %s27_s18 = sadd.s32 1, %s1644_s16  ;;  %p1329_p0 = scmp.ge.s32.totalorder %s1648_s17, 1  ;;  %s1648_s17 = sphi %s1679_s17, %s15_s17   ;;  %s1644_s16 = sphi %s1677_s16, %s2527_s16   ;;  %s1640_s15 = sphi %s1675_s15, %s2526_s15  }
   0x3   : > { %p29_p1 = scmp.ge.s32.totalorder %s27_s18, 2  ;;  %p196_p2 = scmp.lt.s32.totalorder %s1648_s17, 3 }
   0x5   : > { %s2529_s18 = smov (%p29_p1, %s27_s18), 0  ;;  %p197_p3 = pnand %p1329_p0, %p196_p2 }
   0x6   : > { %v282_v0 = vld [vmem:[%s2522_s1 + $0x8] sm:$0xff] (!%p197_p3)  ;;  %v281_v2 = vld [vmem:[%s2522_s1] sm:$0xff] (!%p197_p3)  ;;  %v284_v5 = vld [vmem:[%s2522_s1 + $0x18] sm:$0xff] (!%p197_p3)  ;;  %p245_p4 = scmp.lt.s32.totalorder (!%p197_p3), %s1640_s15, 1  ;;  %vm844_vm0 = vcmask (!%p197_p3), 1043456   ;;  %vm862_vm1 = vcmask (!%p197_p3), 3072  }
   0x7   : > { %200 = sbr.rel (%p197_p3) target bundleno = 578 (0x242), region = 28  ;;  %v290_v1 = vld [vmem:[%s2522_s1 + $0x48] sm:$0xff] (!%p197_p3)  ;;  %v289_v4 = vld [vmem:[%s2522_s1 + $0x40] sm:$0xff] (!%p197_p3)  ;;  %v292_v6 = vld [vmem:[%s2522_s1 + $0x58] sm:$0xff] (!%p197_p3)  ;;  %vm1144_vm2 = vcmask (!%p197_p3), 27648  }
   0x8   : > { %v1340_v3 = vpack.c.bf16 (!%p197_p3), %v290_v1, %v282_v0  ;;  %v1342_v7 = vpack.c.bf16 (!%p197_p3), %v289_v4, %v281_v2  ;;  %v1404_v8 = vpack.c.bf16 (!%p197_p3), %v292_v6, %v284_v5  ;;  %v298_v9 = vld [vmem:[%s2522_s1 + $0x88] sm:$0xff] (!%p197_p3)  ;;  %v283_v11 = vld [vmem:[%s2522_s1 + $0x10] sm:$0xff] (!%p197_p3)  ;;  %v297_v14 = vld [vmem:[%s2522_s1 + $0x80] sm:$0xff] (!%p197_p3) }
   0x9   : > { %v306_v10 = vld [vmem:[%s2522_s1 + $0xc8] sm:$0xff] (!%p197_p3)  ;;  %v291_v13 = vld [vmem:[%s2522_s1 + $0x50] sm:$0xff] (!%p197_p3)  ;;  %v305_v15 = vld [vmem:[%s2522_s1 + $0xc0] sm:$0xff] (!%p197_p3) }
   0xa   : > { %1341 = vmatprep.subr.bf16.mxu0 (!%p197_p3), %v1340_v3  ;;  %v1344_v12 = vpack.c.bf16 (!%p197_p3), %v306_v10, %v298_v9  ;;  %1405 = vmatprep.subr.bf16.mxu1 (!%p197_p3), %v1404_v8  ;;  %v1406_v16 = vpack.c.bf16 (!%p197_p3), %v291_v13, %v283_v11  ;;  %v1346_v17 = vpack.c.bf16 (!%p197_p3), %v305_v15, %v297_v14  ;;  %v300_v18 = vld [vmem:[%s2522_s1 + $0x98] sm:$0xff] (!%p197_p3)  ;;  %v314_v20 = vld [vmem:[%s2522_s1 + $0x108] sm:$0xff] (!%p197_p3)  ;;  %v299_v23 = vld [vmem:[%s2522_s1 + $0x90] sm:$0xff] (!%p197_p3) }
   0xb   : > { %1343 = vmatpush1.bf16.msra.mxu0 (!%p197_p3), %v1342_v7  ;;  %v308_v19 = vld [vmem:[%s2522_s1 + $0xd8] sm:$0xff] (!%p197_p3)  ;;  %v322_v22 = vld [vmem:[%s2522_s1 + $0x148] sm:$0xff] (!%p197_p3)  ;;  %v307_v24 = vld [vmem:[%s2522_s1 + $0xd0] sm:$0xff] (!%p197_p3) }
   0xc   : > { %1345 = vmatprep.subr.bf16.mxu0 (!%p197_p3), %v1344_v12  ;;  %v1408_v21 = vpack.c.bf16 (!%p197_p3), %v308_v19, %v300_v18  ;;  %1407 = vmatpush1.bf16.msra.mxu1 (!%p197_p3), %v1406_v16  ;;  %v1348_v25 = vpack.c.bf16 (!%p197_p3), %v322_v22, %v314_v20  ;;  %v1410_v26 = vpack.c.bf16 (!%p197_p3), %v307_v24, %v299_v23  ;;  %v313_v27 = vld [vmem:[%s2522_s1 + $0x100] sm:$0xff] (!%p197_p3)  ;;  %v316_v29 = vld [vmem:[%s2522_s1 + $0x118] sm:$0xff] (!%p197_p3)  ;;  %v330_v31 = vld [vmem:[%s2522_s1 + $0x188] sm:$0xff] (!%p197_p3) }
   0xd   : > { %v321_v28 = vld [vmem:[%s2522_s1 + $0x140] sm:$0xff] (!%p197_p3)  ;;  %v324_v30 = vld [vmem:[%s2522_s1 + $0x158] sm:$0xff] (!%p197_p3)  ;;  %v338_v32 = vld [vmem:[%s2522_s1 + $0x1c8] sm:$0xff] (!%p197_p3) }
   0xe   : > { %1409 = vmatprep.subr.bf16.mxu1 %v1408_v21  ;;  %v1350_v33 = vpack.c.bf16 %v321_v28, %v313_v27  ;;  %v1412_v34 = vpack.c.bf16 %v324_v30, %v316_v29  ;;  %v315_v35 = vld [vmem:[%s2522_s1 + $0x110] sm:$0xff]  ;;  %v329_v37 = vld [vmem:[%s2522_s1 + $0x180] sm:$0xff]  ;;  %v1352_v38 = vpack.c.bf16 %v338_v32, %v330_v31  ;;  %v332_v40 = vld [vmem:[%s2522_s1 + $0x198] sm:$0xff]  ;;  %s2531_s15 = smov (!%p245_p4, %s1640_s15), 1 }
   0xf   : > { %1347 = vmatpush1.bf16.msra.mxu0 %v1346_v17  ;;  %v323_v36 = vld [vmem:[%s2522_s1 + $0x150] sm:$0xff]  ;;  %v337_v39 = vld [vmem:[%s2522_s1 + $0x1c0] sm:$0xff]  ;;  %v340_v41 = vld [vmem:[%s2522_s1 + $0x1d8] sm:$0xff]  ;;  %s1338_s29 = sshll.u32 %s2531_s15, 3  ;;  %s1339_s30 = sshll.u32 %s2531_s15, 5 }
  0x10   : > { %1349 = vmatprep.subr.bf16.mxu0 %v1348_v25  ;;  %1411 = vmatpush1.bf16.msra.mxu1 %v1410_v26  ;;  %v1414_v42 = vpack.c.bf16 %v323_v36, %v315_v35  ;;  %v346_v43 = vld [vmem:[%s2522_s1 + $0x208] sm:$0xff]  ;;  %v1416_v45 = vpack.c.bf16 %v340_v41, %v332_v40  ;;  %v331_v46 = vld [vmem:[%s2522_s1 + $0x190] sm:$0xff]  ;;  %v1354_v48 = vpack.c.bf16 %v337_v39, %v329_v37  ;;  %v348_v49 = vld [vmem:[%s2522_s1 + $0x218] sm:$0xff]  ;;  %s249_s22 = scalar_lea.vmem %s2521_s0, %s1338_s29  ;;  %s2492_s6 = scalar_lea.vmem %s2523_s2, %s1339_s30 }
  0x11   : > { %v354_v44 = vld [vmem:[%s2522_s1 + $0x248] sm:$0xff]  ;;  %1413 = vmatprep.subr.bf16.mxu1 %v1412_v34  ;;  %v339_v47 = vld [vmem:[%s2522_s1 + $0x1d0] sm:$0xff]  ;;  %v356_v50 = vld [vmem:[%s2522_s1 + $0x258] sm:$0xff]  ;;  %s1334_s7 = sshll.u32 %s2531_s15, 2 }
  0x12   : > { %v1356_v51 = vpack.c.bf16 %v354_v44, %v346_v43  ;;  %v345_v52 = vld [vmem:[%s2522_s1 + $0x200] sm:$0xff]  ;;  %v1418_v54 = vpack.c.bf16 %v339_v47, %v331_v46  ;;  %v362_v55 = vld [vmem:[%s2522_s1 + $0x288] sm:$0xff]  ;;  %v1420_v57 = vpack.c.bf16 %v356_v50, %v348_v49  ;;  %v347_v58 = vld [vmem:[%s2522_s1 + $0x210] sm:$0xff]  ;;  %s272_s10 = scalar_lea.vmem %s2524_s3, %s1334_s7  ;;  %s279_s13 = scalar_lea.vmem %s2525_s4, %s1334_s7 }
  0x13   : > { %1351 = vmatpush1.bf16.msra.mxu0 %v1350_v33  ;;  %v353_v53 = vld [vmem:[%s2522_s1 + $0x240] sm:$0xff]  ;;  %v370_v56 = vld [vmem:[%s2522_s1 + $0x2c8] sm:$0xff]  ;;  %v355_v59 = vld [vmem:[%s2522_s1 + $0x250] sm:$0xff] }
  0x14   : > { %1353 = vmatprep.subr.bf16.mxu0 %v1352_v38  ;;  %1415 = vmatpush1.bf16.msra.mxu1 %v1414_v42  ;;  %v1358_v60 = vpack.c.bf16 %v353_v53, %v345_v52  ;;  %v364_v61 = vld [vmem:[%s2522_s1 + $0x298] sm:$0xff]  ;;  %v1360_v63 = vpack.c.bf16 %v370_v56, %v362_v55  ;;  %v361_v0 = vld [vmem:[%s2522_s1 + $0x280] sm:$0xff]  ;;  %v1422_v2 = vpack.c.bf16 %v355_v59, %v347_v58  ;;  %v378_v3 = vld [vmem:[%s2522_s1 + $0x308] sm:$0xff] }
  0x15   : > { %1417 = vmatprep.subr.bf16.mxu1 %v1416_v45  ;;  %v372_v62 = vld [vmem:[%s2522_s1 + $0x2d8] sm:$0xff]  ;;  %v369_v1 = vld [vmem:[%s2522_s1 + $0x2c0] sm:$0xff]  ;;  %v386_v4 = vld [vmem:[%s2522_s1 + $0x348] sm:$0xff] }
  0x16   : > { %v1424_v5 = vpack.c.bf16 %v372_v62, %v364_v61  ;;  %v363_v6 = vld [vmem:[%s2522_s1 + $0x290] sm:$0xff]  ;;  %v1362_v8 = vpack.c.bf16 %v369_v1, %v361_v0  ;;  %v380_v9 = vld [vmem:[%s2522_s1 + $0x318] sm:$0xff]  ;;  %v1364_v11 = vpack.c.bf16 %v386_v4, %v378_v3  ;;  %v377_v12 = vld [vmem:[%s2522_s1 + $0x300] sm:$0xff] }
  0x17   : > { %1355 = vmatpush1.bf16.msra.mxu0 %v1354_v48  ;;  %v371_v7 = vld [vmem:[%s2522_s1 + $0x2d0] sm:$0xff]  ;;  %v388_v10 = vld [vmem:[%s2522_s1 + $0x358] sm:$0xff]  ;;  %v385_v13 = vld [vmem:[%s2522_s1 + $0x340] sm:$0xff] }
  0x18   : > { %1357 = vmatprep.subr.bf16.mxu0 %v1356_v51  ;;  %1419 = vmatpush1.bf16.msra.mxu1 %v1418_v54  ;;  %v1426_v14 = vpack.c.bf16 %v371_v7, %v363_v6  ;;  %v394_v15 = vld [vmem:[%s2522_s1 + $0x388] sm:$0xff]  ;;  %v1428_v17 = vpack.c.bf16 %v388_v10, %v380_v9  ;;  %v379_v18 = vld [vmem:[%s2522_s1 + $0x310] sm:$0xff]  ;;  %v1366_v20 = vpack.c.bf16 %v385_v13, %v377_v12  ;;  %v396_v21 = vld [vmem:[%s2522_s1 + $0x398] sm:$0xff] }
  0x19   : > { %1421 = vmatprep.subr.bf16.mxu1 %v1420_v57  ;;  %v402_v16 = vld [vmem:[%s2522_s1 + $0x3c8] sm:$0xff]  ;;  %v387_v19 = vld [vmem:[%s2522_s1 + $0x350] sm:$0xff]  ;;  %v404_v22 = vld [vmem:[%s2522_s1 + $0x3d8] sm:$0xff] }
  0x1a   : > { %v1368_v23 = vpack.c.bf16 %v402_v16, %v394_v15  ;;  %v393_v24 = vld [vmem:[%s2522_s1 + $0x380] sm:$0xff]  ;;  %v1430_v26 = vpack.c.bf16 %v387_v19, %v379_v18  ;;  %v410_v27 = vld [vmem:[%s2522_s1 + $0x408] sm:$0xff]  ;;  %v1432_v29 = vpack.c.bf16 %v404_v22, %v396_v21  ;;  %v395_v30 = vld [vmem:[%s2522_s1 + $0x390] sm:$0xff] }
  0x1b   : > { %1359 = vmatpush1.bf16.msra.mxu0 %v1358_v60  ;;  %v401_v25 = vld [vmem:[%s2522_s1 + $0x3c0] sm:$0xff]  ;;  %v418_v28 = vld [vmem:[%s2522_s1 + $0x448] sm:$0xff]  ;;  %v403_v31 = vld [vmem:[%s2522_s1 + $0x3d0] sm:$0xff] }
  0x1c   : > { %1361 = vmatprep.subr.bf16.mxu0 %v1360_v63  ;;  %1423 = vmatpush1.bf16.msra.mxu1 %v1422_v2  ;;  %v1370_v32 = vpack.c.bf16 %v401_v25, %v393_v24  ;;  %v412_v33 = vld [vmem:[%s2522_s1 + $0x418] sm:$0xff]  ;;  %v1372_v35 = vpack.c.bf16 %v418_v28, %v410_v27  ;;  %v409_v36 = vld [vmem:[%s2522_s1 + $0x400] sm:$0xff]  ;;  %v1434_v38 = vpack.c.bf16 %v403_v31, %v395_v30  ;;  %v426_v39 = vld [vmem:[%s2522_s1 + $0x488] sm:$0xff] }
  0x1d   : > { %1425 = vmatprep.subr.bf16.mxu1 %v1424_v5  ;;  %v420_v34 = vld [vmem:[%s2522_s1 + $0x458] sm:$0xff]  ;;  %v417_v37 = vld [vmem:[%s2522_s1 + $0x440] sm:$0xff]  ;;  %v434_v40 = vld [vmem:[%s2522_s1 + $0x4c8] sm:$0xff] }
  0x1e   : > { %v1436_v41 = vpack.c.bf16 %v420_v34, %v412_v33  ;;  %v411_v42 = vld [vmem:[%s2522_s1 + $0x410] sm:$0xff]  ;;  %v1374_v44 = vpack.c.bf16 %v417_v37, %v409_v36  ;;  %v428_v45 = vld [vmem:[%s2522_s1 + $0x498] sm:$0xff]  ;;  %v1376_v47 = vpack.c.bf16 %v434_v40, %v426_v39  ;;  %v425_v48 = vld [vmem:[%s2522_s1 + $0x480] sm:$0xff] }
  0x1f   : > { %1363 = vmatpush1.bf16.msra.mxu0 %v1362_v8  ;;  %v419_v43 = vld [vmem:[%s2522_s1 + $0x450] sm:$0xff]  ;;  %v436_v46 = vld [vmem:[%s2522_s1 + $0x4d8] sm:$0xff]  ;;  %v433_v49 = vld [vmem:[%s2522_s1 + $0x4c0] sm:$0xff] }
  0x20   : > { %1365 = vmatprep.subr.bf16.mxu0 %v1364_v11  ;;  %1427 = vmatpush1.bf16.msra.mxu1 %v1426_v14  ;;  %v1438_v50 = vpack.c.bf16 %v419_v43, %v411_v42  ;;  %v442_v51 = vld [vmem:[%s2522_s1 + $0x508] sm:$0xff]  ;;  %v1440_v53 = vpack.c.bf16 %v436_v46, %v428_v45  ;;  %v427_v54 = vld [vmem:[%s2522_s1 + $0x490] sm:$0xff]  ;;  %v1378_v56 = vpack.c.bf16 %v433_v49, %v425_v48  ;;  %v444_v57 = vld [vmem:[%s2522_s1 + $0x518] sm:$0xff] }
  0x21   : > { %1429 = vmatprep.subr.bf16.mxu1 %v1428_v17  ;;  %v450_v52 = vld [vmem:[%s2522_s1 + $0x548] sm:$0xff]  ;;  %v435_v55 = vld [vmem:[%s2522_s1 + $0x4d0] sm:$0xff]  ;;  %v452_v58 = vld [vmem:[%s2522_s1 + $0x558] sm:$0xff] }
  0x22   : > { %v1380_v59 = vpack.c.bf16 %v450_v52, %v442_v51  ;;  %v441_v60 = vld [vmem:[%s2522_s1 + $0x500] sm:$0xff]  ;;  %v1442_v62 = vpack.c.bf16 %v435_v55, %v427_v54  ;;  %v458_v63 = vld [vmem:[%s2522_s1 + $0x588] sm:$0xff]  ;;  %v1444_v1 = vpack.c.bf16 %v452_v58, %v444_v57  ;;  %v443_v2 = vld [vmem:[%s2522_s1 + $0x510] sm:$0xff] }
  0x23   : > { %1367 = vmatpush1.bf16.msra.mxu0 %v1366_v20  ;;  %v449_v61 = vld [vmem:[%s2522_s1 + $0x540] sm:$0xff]  ;;  %v466_v0 = vld [vmem:[%s2522_s1 + $0x5c8] sm:$0xff]  ;;  %v451_v3 = vld [vmem:[%s2522_s1 + $0x550] sm:$0xff] }
  0x24   : > { %1369 = vmatprep.subr.bf16.mxu0 %v1368_v23  ;;  %1431 = vmatpush1.bf16.msra.mxu1 %v1430_v26  ;;  %v1382_v4 = vpack.c.bf16 %v449_v61, %v441_v60  ;;  %v460_v5 = vld [vmem:[%s2522_s1 + $0x598] sm:$0xff]  ;;  %v1384_v7 = vpack.c.bf16 %v466_v0, %v458_v63  ;;  %v457_v8 = vld [vmem:[%s2522_s1 + $0x580] sm:$0xff]  ;;  %v1446_v11 = vpack.c.bf16 %v451_v3, %v443_v2  ;;  %v474_v12 = vld [vmem:[%s2522_s1 + $0x608] sm:$0xff] }
  0x25   : > { %1433 = vmatprep.subr.bf16.mxu1 %v1432_v29  ;;  %v468_v6 = vld [vmem:[%s2522_s1 + $0x5d8] sm:$0xff]  ;;  %v465_v9 = vld [vmem:[%s2522_s1 + $0x5c0] sm:$0xff]  ;;  %v482_v13 = vld [vmem:[%s2522_s1 + $0x648] sm:$0xff] }
  0x26   : > { %v1987_v10 = vld [vmem:[%s249_s22] sm:$0xff]  ;;  %v1448_v15 = vpack.c.bf16 %v468_v6, %v460_v5  ;;  %v459_v16 = vld [vmem:[%s2522_s1 + $0x590] sm:$0xff]  ;;  %v1386_v18 = vpack.c.bf16 %v465_v9, %v457_v8  ;;  %v476_v19 = vld [vmem:[%s2522_s1 + $0x618] sm:$0xff]  ;;  %v1388_v21 = vpack.c.bf16 %v482_v13, %v474_v12 }
  0x27   : > { %1371 = vmatpush1.bf16.msra.mxu0 %v1370_v32  ;;  %v1997_v14 = vcombine.high %v1987_v10, %v1987_v10  ;;  %v467_v17 = vld [vmem:[%s2522_s1 + $0x5d0] sm:$0xff]  ;;  %v484_v20 = vld [vmem:[%s2522_s1 + $0x658] sm:$0xff]  ;;  %v473_v22 = vld [vmem:[%s2522_s1 + $0x600] sm:$0xff] }
  0x28   : > { %1373 = vmatprep.subr.bf16.mxu0 %v1372_v35  ;;  %1435 = vmatpush1.bf16.msra.mxu1 %v1434_v38  ;;  %v481_v23 = vld [vmem:[%s2522_s1 + $0x640] sm:$0xff]  ;;  %v1450_v24 = vpack.c.bf16 %v467_v17, %v459_v16  ;;  %v490_v25 = vld [vmem:[%s2522_s1 + $0x688] sm:$0xff]  ;;  %v1452_v27 = vpack.c.bf16 %v484_v20, %v476_v19  ;;  %v475_v28 = vld [vmem:[%s2522_s1 + $0x610] sm:$0xff] }
  0x29   : > { %1437 = vmatprep.subr.bf16.mxu1 %v1436_v41  ;;  %604 = vmatprep.mubr.f32.mxu0 %v1997_v14  ;;  %v498_v26 = vld [vmem:[%s2522_s1 + $0x6c8] sm:$0xff]  ;;  %v483_v29 = vld [vmem:[%s2522_s1 + $0x650] sm:$0xff]  ;;  %v1390_v30 = vpack.c.bf16 %v481_v23, %v473_v22  ;;  %v492_v31 = vld [vmem:[%s2522_s1 + $0x698] sm:$0xff] }
  0x2a   : > { %675 = vmatprep.mubr.f32.mxu1 %v1997_v14  ;;  %v500_v32 = vld [vmem:[%s2522_s1 + $0x6d8] sm:$0xff]  ;;  %v1392_v33 = vpack.c.bf16 %v498_v26, %v490_v25  ;;  %v489_v34 = vld [vmem:[%s2522_s1 + $0x680] sm:$0xff]  ;;  %v1454_v36 = vpack.c.bf16 %v483_v29, %v475_v28  ;;  %v506_v37 = vld [vmem:[%s2522_s1 + $0x708] sm:$0xff] }
  0x2b   : > { %1375 = vmatpush1.bf16.msra.mxu0 %v1374_v44  ;;  %v497_v35 = vld [vmem:[%s2522_s1 + $0x6c0] sm:$0xff]  ;;  %v514_v38 = vld [vmem:[%s2522_s1 + $0x748] sm:$0xff]  ;;  %v1456_v39 = vpack.c.bf16 %v500_v32, %v492_v31  ;;  %v491_v40 = vld [vmem:[%s2522_s1 + $0x690] sm:$0xff] }
  0x2c   : > { %1377 = vmatprep.subr.bf16.mxu0 %v1376_v47  ;;  %1439 = vmatpush1.bf16.msra.mxu1 %v1438_v50  ;;  %v499_v41 = vld [vmem:[%s2522_s1 + $0x6d0] sm:$0xff]  ;;  %v1394_v42 = vpack.c.bf16 %v497_v35, %v489_v34  ;;  %v508_v43 = vld [vmem:[%s2522_s1 + $0x718] sm:$0xff]  ;;  %v1396_v45 = vpack.c.bf16 %v514_v38, %v506_v37  ;;  %v505_v46 = vld [vmem:[%s2522_s1 + $0x700] sm:$0xff] }
  0x2d   : > { %1441 = vmatprep.subr.bf16.mxu1 %v1440_v53  ;;  %v516_v44 = vld [vmem:[%s2522_s1 + $0x758] sm:$0xff]  ;;  %v513_v47 = vld [vmem:[%s2522_s1 + $0x740] sm:$0xff]  ;;  %v1458_v48 = vpack.c.bf16 %v499_v41, %v491_v40  ;;  %v522_v49 = vld [vmem:[%s2522_s1 + $0x788] sm:$0xff] }
  0x2e   : > { %v530_v50 = vld [vmem:[%s2522_s1 + $0x7c8] sm:$0xff]  ;;  %v1460_v51 = vpack.c.bf16 %v516_v44, %v508_v43  ;;  %v507_v52 = vld [vmem:[%s2522_s1 + $0x710] sm:$0xff]  ;;  %v1398_v54 = vpack.c.bf16 %v513_v47, %v505_v46  ;;  %v524_v55 = vld [vmem:[%s2522_s1 + $0x798] sm:$0xff] }
  0x2f   : > { %1379 = vmatpush1.bf16.msra.mxu0 %v1378_v56  ;;  %v515_v53 = vld [vmem:[%s2522_s1 + $0x750] sm:$0xff]  ;;  %v532_v56 = vld [vmem:[%s2522_s1 + $0x7d8] sm:$0xff]  ;;  %v1400_v57 = vpack.c.bf16 %v530_v50, %v522_v49  ;;  %v521_v58 = vld [vmem:[%s2522_s1 + $0x780] sm:$0xff] }
  0x30   : > { %1381 = vmatprep.subr.bf16.mxu0 %v1380_v59  ;;  %1443 = vmatpush1.bf16.msra.mxu1 %v1442_v62  ;;  %v529_v59 = vld [vmem:[%s2522_s1 + $0x7c0] sm:$0xff]  ;;  %v1462_v60 = vpack.c.bf16 %v515_v53, %v507_v52  ;;  %v286_v61 = vld [vmem:[%s2522_s1 + $0x28] sm:$0xff]  ;;  %v1464_v63 = vpack.c.bf16 %v532_v56, %v524_v55  ;;  %v523_v0 = vld [vmem:[%s2522_s1 + $0x790] sm:$0xff] }
  0x31   : > { %1445 = vmatprep.subr.bf16.mxu1 %v1444_v1  ;;  %v294_v62 = vld [vmem:[%s2522_s1 + $0x68] sm:$0xff]  ;;  %v531_v1 = vld [vmem:[%s2522_s1 + $0x7d0] sm:$0xff]  ;;  %v1402_v2 = vpack.c.bf16 %v529_v59, %v521_v58  ;;  %v288_v3 = vld [vmem:[%s2522_s1 + $0x38] sm:$0xff] }
  0x32   : > { %v1468_v5 = vpack.c.bf16 %v294_v62, %v286_v61  ;;  %v285_v6 = vld [vmem:[%s2522_s1 + $0x20] sm:$0xff]  ;;  %v1466_v8 = vpack.c.bf16 %v531_v1, %v523_v0  ;;  %v302_v9 = vld [vmem:[%s2522_s1 + $0xa8] sm:$0xff]  ;;  %v287_v13 = vld [vmem:[%s2522_s1 + $0x30] sm:$0xff] }
  0x33   : > { %1383 = vmatpush1.bf16.msra.mxu0 %v1382_v4  ;;  %v296_v4 = vld [vmem:[%s2522_s1 + $0x78] sm:$0xff]  ;;  %v301_v20 = vld [vmem:[%s2522_s1 + $0xa0] sm:$0xff]  ;;  %v318_v23 = vld [vmem:[%s2522_s1 + $0x128] sm:$0xff] }
  0x34   : > { %1385 = vmatprep.subr.bf16.mxu0 %v1384_v7  ;;  %1447 = vmatpush1.bf16.msra.mxu1 %v1446_v11  ;;  %v293_v7 = vld [vmem:[%s2522_s1 + $0x60] sm:$0xff]  ;;  %v310_v11 = vld [vmem:[%s2522_s1 + $0xe8] sm:$0xff]  ;;  %v1532_v12 = vpack.c.bf16 %v296_v4, %v288_v3  ;;  %v304_v17 = vld [vmem:[%s2522_s1 + $0xb8] sm:$0xff] }
  0x35   : > { %1449 = vmatprep.subr.bf16.mxu1 %v1448_v15  ;;  %v295_v15 = vld [vmem:[%s2522_s1 + $0x70] sm:$0xff]  ;;  %v1470_v16 = vpack.c.bf16 %v293_v7, %v285_v6  ;;  %v1472_v19 = vpack.c.bf16 %v310_v11, %v302_v9  ;;  %v320_v29 = vld [vmem:[%s2522_s1 + $0x138] sm:$0xff]  ;;  %v317_v32 = vld [vmem:[%s2522_s1 + $0x120] sm:$0xff] }
  0x36   : > { %v1534_v22 = vpack.c.bf16 %v295_v15, %v287_v13  ;;  %v303_v26 = vld [vmem:[%s2522_s1 + $0xb0] sm:$0xff]  ;;  %v334_v35 = vld [vmem:[%s2522_s1 + $0x1a8] sm:$0xff]  ;;  %v336_v41 = vld [vmem:[%s2522_s1 + $0x1b8] sm:$0xff] }
  0x37   : > { %1387 = vmatpush1.bf16.msra.mxu0 %v1386_v18  ;;  %v312_v18 = vld [vmem:[%s2522_s1 + $0xf8] sm:$0xff]  ;;  %v319_v38 = vld [vmem:[%s2522_s1 + $0x130] sm:$0xff]  ;;  %v333_v43 = vld [vmem:[%s2522_s1 + $0x1a0] sm:$0xff] }
  0x38   : > { %1389 = vmatprep.subr.bf16.mxu0 %v1388_v21  ;;  %1451 = vmatpush1.bf16.msra.mxu1 %v1450_v24  ;;  %v309_v21 = vld [vmem:[%s2522_s1 + $0xe0] sm:$0xff]  ;;  %v326_v24 = vld [vmem:[%s2522_s1 + $0x168] sm:$0xff]  ;;  %v1536_v25 = vpack.c.bf16 %v312_v18, %v304_v17  ;;  %v335_v49 = vld [vmem:[%s2522_s1 + $0x1b0] sm:$0xff] }
  0x39   : > { %1453 = vmatprep.subr.bf16.mxu1 %v1452_v27  ;;  %v311_v27 = vld [vmem:[%s2522_s1 + $0xf0] sm:$0xff]  ;;  %v1474_v28 = vpack.c.bf16 %v309_v21, %v301_v20  ;;  %v1476_v31 = vpack.c.bf16 %v326_v24, %v318_v23  ;;  %v341_v44 = vld [vmem:[%s2522_s1 + $0x1e0] sm:$0xff]  ;;  %v350_v46 = vld [vmem:[%s2522_s1 + $0x228] sm:$0xff] }
  0x3a   : > { %v1538_v34 = vpack.c.bf16 %v311_v27, %v303_v26  ;;  %v358_v47 = vld [vmem:[%s2522_s1 + $0x268] sm:$0xff]  ;;  %v343_v50 = vld [vmem:[%s2522_s1 + $0x1f0] sm:$0xff]  ;;  %v352_v52 = vld [vmem:[%s2522_s1 + $0x238] sm:$0xff] }
  0x3b   : > { %1391 = vmatpush1.bf16.msra.mxu0 %v1390_v30  ;;  %v328_v30 = vld [vmem:[%s2522_s1 + $0x178] sm:$0xff]  ;;  %v349_v55 = vld [vmem:[%s2522_s1 + $0x220] sm:$0xff]  ;;  %v366_v58 = vld [vmem:[%s2522_s1 + $0x2a8] sm:$0xff] }
  0x3c   : > { %1393 = vmatprep.subr.bf16.mxu0 %v1392_v33  ;;  %1455 = vmatpush1.bf16.msra.mxu1 %v1454_v36  ;;  %v325_v33 = vld [vmem:[%s2522_s1 + $0x160] sm:$0xff]  ;;  %v342_v36 = vld [vmem:[%s2522_s1 + $0x1e8] sm:$0xff]  ;;  %v1540_v37 = vpack.c.bf16 %v328_v30, %v320_v29  ;;  %v360_v53 = vld [vmem:[%s2522_s1 + $0x278] sm:$0xff] }
  0x3d   : > { %1457 = vmatprep.subr.bf16.mxu1 %v1456_v39  ;;  %v327_v39 = vld [vmem:[%s2522_s1 + $0x170] sm:$0xff]  ;;  %v1478_v40 = vpack.c.bf16 %v325_v33, %v317_v32  ;;  %v357_v56 = vld [vmem:[%s2522_s1 + $0x260] sm:$0xff]  ;;  %v374_v59 = vld [vmem:[%s2522_s1 + $0x2e8] sm:$0xff] }
  0x3e   : > { %v351_v61 = vld [vmem:[%s2522_s1 + $0x230] sm:$0xff]  ;;  %v368_v0 = vld [vmem:[%s2522_s1 + $0x2b8] sm:$0xff]  ;;  %v365_v3 = vld [vmem:[%s2522_s1 + $0x2a0] sm:$0xff] }
  0x3f   : > { %1395 = vmatpush1.bf16.msra.mxu0 %v1394_v42  ;;  %v1480_v42 = vpack.c.bf16 %v342_v36, %v334_v35  ;;  %v359_v62 = vld [vmem:[%s2522_s1 + $0x270] sm:$0xff]  ;;  %v376_v1 = vld [vmem:[%s2522_s1 + $0x2f8] sm:$0xff]  ;;  %v373_v4 = vld [vmem:[%s2522_s1 + $0x2e0] sm:$0xff] }
  0x40   : > { %1397 = vmatprep.subr.bf16.mxu0 %v1396_v45  ;;  %1459 = vmatpush1.bf16.msra.mxu1 %v1458_v48  ;;  %v1542_v45 = vpack.c.bf16 %v327_v39, %v319_v38  ;;  %v382_v6 = vld [vmem:[%s2522_s1 + $0x328] sm:$0xff]  ;;  %v367_v9 = vld [vmem:[%s2522_s1 + $0x2b0] sm:$0xff]  ;;  %v384_v13 = vld [vmem:[%s2522_s1 + $0x338] sm:$0xff] }
  0x41   : > { %1461 = vmatprep.subr.bf16.mxu1 %v1460_v51  ;;  %v1482_v51 = vpack.c.bf16 %v341_v44, %v333_v43  ;;  %v390_v7 = vld [vmem:[%s2522_s1 + $0x368] sm:$0xff]  ;;  %v375_v11 = vld [vmem:[%s2522_s1 + $0x2f0] sm:$0xff]  ;;  %v392_v15 = vld [vmem:[%s2522_s1 + $0x378] sm:$0xff] }
  0x42   : > { %v381_v17 = vld [vmem:[%s2522_s1 + $0x320] sm:$0xff]  ;;  %v398_v20 = vld [vmem:[%s2522_s1 + $0x3a8] sm:$0xff]  ;;  %v383_v23 = vld [vmem:[%s2522_s1 + $0x330] sm:$0xff] }
  0x43   : > { %1399 = vmatpush1.bf16.msra.mxu0 %v1398_v54  ;;  %v1484_v54 = vpack.c.bf16 %v358_v47, %v350_v46  ;;  %v389_v18 = vld [vmem:[%s2522_s1 + $0x360] sm:$0xff]  ;;  %v406_v21 = vld [vmem:[%s2522_s1 + $0x3e8] sm:$0xff]  ;;  %v391_v24 = vld [vmem:[%s2522_s1 + $0x370] sm:$0xff] }
  0x44   : > { %1401 = vmatprep.subr.bf16.mxu0 %v1400_v57  ;;  %1463 = vmatpush1.bf16.msra.mxu1 %v1462_v60  ;;  %v1546_v57 = vpack.c.bf16 %v343_v50, %v335_v49  ;;  %v1548_v60 = vpack.c.bf16 %v360_v53, %v352_v52  ;;  %v400_v26 = vld [vmem:[%s2522_s1 + $0x3b8] sm:$0xff]  ;;  %v397_v29 = vld [vmem:[%s2522_s1 + $0x3a0] sm:$0xff]  ;;  %v414_v32 = vld [vmem:[%s2522_s1 + $0x428] sm:$0xff] }
  0x45   : > { %1465 = vmatprep.subr.bf16.mxu1 %v1464_v63  ;;  %v1486_v63 = vpack.c.bf16 %v357_v56, %v349_v55  ;;  %v408_v27 = vld [vmem:[%s2522_s1 + $0x3f8] sm:$0xff]  ;;  %v405_v30 = vld [vmem:[%s2522_s1 + $0x3e0] sm:$0xff]  ;;  %v422_v33 = vld [vmem:[%s2522_s1 + $0x468] sm:$0xff] }
  0x46   : > { %v399_v35 = vld [vmem:[%s2522_s1 + $0x3b0] sm:$0xff]  ;;  %v416_v38 = vld [vmem:[%s2522_s1 + $0x438] sm:$0xff]  ;;  %v430_v43 = vld [vmem:[%s2522_s1 + $0x4a8] sm:$0xff] }
  0x47   : > { %1403 = vmatpush1.bf16.msra.mxu0 %v1402_v2  ;;  %v1488_v2 = vpack.c.bf16 %v374_v59, %v366_v58  ;;  %v407_v36 = vld [vmem:[%s2522_s1 + $0x3f0] sm:$0xff]  ;;  %v424_v39 = vld [vmem:[%s2522_s1 + $0x478] sm:$0xff]  ;;  %v438_v44 = vld [vmem:[%s2522_s1 + $0x4e8] sm:$0xff] }
  0x48   : > { %1469 = vmatprep.subr.bf16.mxu0 %v1468_v5  ;;  %1467 = vmatpush1.bf16.msra.mxu1 %v1466_v8  ;;  %v1550_v5 = vpack.c.bf16 %v359_v62, %v351_v61  ;;  %v1552_v8 = vpack.c.bf16 %v376_v1, %v368_v0  ;;  %v415_v46 = vld [vmem:[%s2522_s1 + $0x430] sm:$0xff]  ;;  %v432_v49 = vld [vmem:[%s2522_s1 + $0x4b8] sm:$0xff]  ;;  %v429_v52 = vld [vmem:[%s2522_s1 + $0x4a0] sm:$0xff] }
  0x49   : > { %1533 = vmatprep.subr.bf16.mxu1 %v1532_v12  ;;  %v1490_v12 = vpack.c.bf16 %v373_v4, %v365_v3  ;;  %v423_v47 = vld [vmem:[%s2522_s1 + $0x470] sm:$0xff]  ;;  %v440_v50 = vld [vmem:[%s2522_s1 + $0x4f8] sm:$0xff]  ;;  %v437_v53 = vld [vmem:[%s2522_s1 + $0x4e0] sm:$0xff] }
  0x4a   : > { %605 = vmatmul.mubr.f32.vlgmr.msra.gmra.mrb[0].mxu0 %v1987_v10  ;;  %v446_v55 = vld [vmem:[%s2522_s1 + $0x528] sm:$0xff]  ;;  %v431_v58 = vld [vmem:[%s2522_s1 + $0x4b0] sm:$0xff]  ;;  %v448_v61 = vld [vmem:[%s2522_s1 + $0x538] sm:$0xff] }
  0x4b   : > { %1471 = vmatpush1.bf16.msra.mxu0 %v1470_v16  ;;  %746 = vmatprep.mubr.f32.mxu0 %v1997_v14  ;;  %v1492_v16 = vpack.c.bf16 %v390_v7, %v382_v6  ;;  %v454_v56 = vld [vmem:[%s2522_s1 + $0x568] sm:$0xff]  ;;  %v439_v59 = vld [vmem:[%s2522_s1 + $0x4f0] sm:$0xff]  ;;  %v456_v62 = vld [vmem:[%s2522_s1 + $0x578] sm:$0xff] }
  0x4c   : > { %676 = vmatmul.mubr.f32.vlgmr.msra.gmra.mrb[0].mxu1 %v1987_v10  ;;  %1473 = vmatprep.subr.bf16.mxu0 %v1472_v19  ;;  %v1554_v19 = vpack.c.bf16 %v375_v11, %v367_v9  ;;  %v445_v0 = vld [vmem:[%s2522_s1 + $0x520] sm:$0xff]  ;;  %v462_v3 = vld [vmem:[%s2522_s1 + $0x5a8] sm:$0xff]  ;;  %v447_v6 = vld [vmem:[%s2522_s1 + $0x530] sm:$0xff] }
  0x4d   : > { %1535 = vmatpush1.bf16.msra.mxu1 %v1534_v22  ;;  %817 = vmatprep.mubr.f32.mxu1 %v1997_v14  ;;  %v344_v14 = vld [vmem:[%s2522_s1 + $0x1f8] sm:$0xff]  ;;  %v1556_v22 = vpack.c.bf16 %v392_v15, %v384_v13  ;;  %v453_v1 = vld [vmem:[%s2522_s1 + $0x560] sm:$0xff]  ;;  %v470_v4 = vld [vmem:[%s2522_s1 + $0x5e8] sm:$0xff] }
  0x4e   : > { %1537 = vmatprep.subr.bf16.mxu1 %v1536_v25  ;;  %v1544_v48 = vpack.c.bf16 %v344_v14, %v336_v41  ;;  %v1494_v25 = vpack.c.bf16 %v389_v18, %v381_v17  ;;  %v413_v41 = vld [vmem:[%s2522_s1 + $0x420] sm:$0xff]  ;;  %v455_v7 = vld [vmem:[%s2522_s1 + $0x570] sm:$0xff]  ;;  %v464_v9 = vld [vmem:[%s2522_s1 + $0x5b8] sm:$0xff] }
  0x4f   : > { %1475 = vmatpush1.bf16.msra.mxu0 %v1474_v28  ;;  %v1496_v28 = vpack.c.bf16 %v406_v21, %v398_v20  ;;  %v421_v14 = vld [vmem:[%s2522_s1 + $0x460] sm:$0xff]  ;;  %v472_v11 = vld [vmem:[%s2522_s1 + $0x5f8] sm:$0xff]  ;;  %v478_v17 = vld [vmem:[%s2522_s1 + $0x628] sm:$0xff] }
  0x50   : > { %1477 = vmatprep.subr.bf16.mxu0 %v1476_v31  ;;  %v1558_v31 = vpack.c.bf16 %v391_v24, %v383_v23  ;;  %v461_v13 = vld [vmem:[%s2522_s1 + $0x5a0] sm:$0xff]  ;;  %v486_v18 = vld [vmem:[%s2522_s1 + $0x668] sm:$0xff]  ;;  %v463_v20 = vld [vmem:[%s2522_s1 + $0x5b0] sm:$0xff] }
  0x51   : > { %1539 = vmatpush1.bf16.msra.mxu1 %v1538_v34  ;;  %v1560_v34 = vpack.c.bf16 %v408_v27, %v400_v26  ;;  %v469_v15 = vld [vmem:[%s2522_s1 + $0x5e0] sm:$0xff]  ;;  %v471_v21 = vld [vmem:[%s2522_s1 + $0x5f0] sm:$0xff]  ;;  %v480_v23 = vld [vmem:[%s2522_s1 + $0x638] sm:$0xff] }
  0x52   : > { %1541 = vmatprep.subr.bf16.mxu1 %v1540_v37  ;;  %v1498_v37 = vpack.c.bf16 %v405_v30, %v397_v29  ;;  %v488_v24 = vld [vmem:[%s2522_s1 + $0x678] sm:$0xff]  ;;  %v477_v26 = vld [vmem:[%s2522_s1 + $0x620] sm:$0xff]  ;;  %v494_v29 = vld [vmem:[%s2522_s1 + $0x6a8] sm:$0xff] }
  0x53   : > { %1479 = vmatpush1.bf16.msra.mxu0 %v1478_v40  ;;  %v1500_v40 = vpack.c.bf16 %v422_v33, %v414_v32  ;;  %v485_v27 = vld [vmem:[%s2522_s1 + $0x660] sm:$0xff]  ;;  %v502_v30 = vld [vmem:[%s2522_s1 + $0x6e8] sm:$0xff]  ;;  %v479_v32 = vld [vmem:[%s2522_s1 + $0x630] sm:$0xff] }
  0x54   : > { %1481 = vmatprep.subr.bf16.mxu0 %v1480_v42  ;;  %v1562_v42 = vpack.c.bf16 %v407_v36, %v399_v35  ;;  %v487_v33 = vld [vmem:[%s2522_s1 + $0x670] sm:$0xff]  ;;  %v496_v35 = vld [vmem:[%s2522_s1 + $0x6b8] sm:$0xff] }
  0x55   : > { %1543 = vmatpush1.bf16.msra.mxu1 %v1542_v45  ;;  %v1564_v45 = vpack.c.bf16 %v424_v39, %v416_v38  ;;  %v504_v36 = vld [vmem:[%s2522_s1 + $0x6f8] sm:$0xff]  ;;  %v493_v38 = vld [vmem:[%s2522_s1 + $0x6a0] sm:$0xff] }
  0x56   : > { %1545 = vmatprep.subr.bf16.mxu1 %v1544_v48  ;;  %v1502_v48 = vpack.c.bf16 %v421_v14, %v413_v41  ;;  %v501_v39 = vld [vmem:[%s2522_s1 + $0x6e0] sm:$0xff]  ;;  %v510_v41 = vld [vmem:[%s2522_s1 + $0x728] sm:$0xff] }
  0x57   : > { %1483 = vmatpush1.bf16.msra.mxu0 %v1482_v51  ;;  %v1504_v51 = vpack.c.bf16 %v438_v44, %v430_v43  ;;  %v518_v14 = vld [vmem:[%s2522_s1 + $0x768] sm:$0xff]  ;;  %v495_v43 = vld [vmem:[%s2522_s1 + $0x6b0] sm:$0xff] }
  0x58   : > { %1485 = vmatprep.subr.bf16.mxu0 %v1484_v54  ;;  %v1566_v54 = vpack.c.bf16 %v423_v47, %v415_v46  ;;  %v503_v44 = vld [vmem:[%s2522_s1 + $0x6f0] sm:$0xff]  ;;  %v512_v46 = vld [vmem:[%s2522_s1 + $0x738] sm:$0xff] }
  0x59   : > { %1547 = vmatpush1.bf16.msra.mxu1 %v1546_v57  ;;  %v1568_v57 = vpack.c.bf16 %v440_v50, %v432_v49  ;;  %v520_v47 = vld [vmem:[%s2522_s1 + $0x778] sm:$0xff]  ;;  %v509_v49 = vld [vmem:[%s2522_s1 + $0x720] sm:$0xff] }
  0x5a   : > { %1549 = vmatprep.subr.bf16.mxu1 %v1548_v60  ;;  %v1506_v60 = vpack.c.bf16 %v437_v53, %v429_v52  ;;  %v517_v50 = vld [vmem:[%s2522_s1 + $0x760] sm:$0xff]  ;;  %v526_v52 = vld [vmem:[%s2522_s1 + $0x7a8] sm:$0xff] }
  0x5b   : > { %1487 = vmatpush1.bf16.msra.mxu0 %v1486_v63  ;;  %v1508_v63 = vpack.c.bf16 %v454_v56, %v446_v55  ;;  %v534_v53 = vld [vmem:[%s2522_s1 + $0x7e8] sm:$0xff]  ;;  %v511_v55 = vld [vmem:[%s2522_s1 + $0x730] sm:$0xff] }
  0x5c   : > { %1489 = vmatprep.subr.bf16.mxu0 %v1488_v2  ;;  %v1570_v2 = vpack.c.bf16 %v439_v59, %v431_v58  ;;  %v519_v56 = vld [vmem:[%s2522_s1 + $0x770] sm:$0xff]  ;;  %v528_v58 = vld [vmem:[%s2522_s1 + $0x7b8] sm:$0xff] }
  0x5d   : > { %1551 = vmatpush1.bf16.msra.mxu1 %v1550_v5  ;;  %v1572_v5 = vpack.c.bf16 %v456_v62, %v448_v61  ;;  %v536_v59 = vld [vmem:[%s2522_s1 + $0x7f8] sm:$0xff]  ;;  %v525_v61 = vld [vmem:[%s2522_s1 + $0x7a0] sm:$0xff] }
  0x5e   : > { %1553 = vmatprep.subr.bf16.mxu1 %v1552_v8  ;;  %v1510_v8 = vpack.c.bf16 %v453_v1, %v445_v0  ;;  %v533_v62 = vld [vmem:[%s2522_s1 + $0x7e0] sm:$0xff]  ;;  %v1592_v0 = vpack.c.bf16 %v536_v59, %v528_v58  ;;  %v527_v1 = vld [vmem:[%s2522_s1 + $0x7b0] sm:$0xff] }
  0x5f   : > { %1491 = vmatpush1.bf16.msra.mxu0 %v1490_v12  ;;  %v1512_v12 = vpack.c.bf16 %v470_v4, %v462_v3  ;;  %v1530_v3 = vpack.c.bf16 %v533_v62, %v525_v61 }
  0x60   : > { %1493 = vmatprep.subr.bf16.mxu0 %v1492_v16  ;;  %v1574_v16 = vpack.c.bf16 %v455_v7, %v447_v6 }
  0x61   : > { %1555 = vmatpush1.bf16.msra.mxu1 %v1554_v19  ;;  %v1576_v19 = vpack.c.bf16 %v472_v11, %v464_v9 }
  0x62   : > { %1557 = vmatprep.subr.bf16.mxu1 %v1556_v22  ;;  %v1514_v22 = vpack.c.bf16 %v469_v15, %v461_v13 }
  0x63   : > { %1495 = vmatpush1.bf16.msra.mxu0 %v1494_v25  ;;  %v1516_v25 = vpack.c.bf16 %v486_v18, %v478_v17 }
  0x64   : > { %1497 = vmatprep.subr.bf16.mxu0 %v1496_v28  ;;  %v1578_v28 = vpack.c.bf16 %v471_v21, %v463_v20 }
  0x65   : > { %1559 = vmatpush1.bf16.msra.mxu1 %v1558_v31  ;;  %v1580_v31 = vpack.c.bf16 %v488_v24, %v480_v23 }
  0x66   : > { %1561 = vmatprep.subr.bf16.mxu1 %v1560_v34  ;;  %v1518_v34 = vpack.c.bf16 %v485_v27, %v477_v26 }
  0x67   : > { %1499 = vmatpush1.bf16.msra.mxu0 %v1498_v37  ;;  %v1520_v37 = vpack.c.bf16 %v502_v30, %v494_v29 }
  0x68   : > { %1501 = vmatprep.subr.bf16.mxu0 %v1500_v40  ;;  %v1582_v40 = vpack.c.bf16 %v487_v33, %v479_v32 }
  0x69   : > { %1563 = vmatpush1.bf16.msra.mxu1 %v1562_v42  ;;  %v1584_v42 = vpack.c.bf16 %v504_v36, %v496_v35 }
  0x6a   : > { %1565 = vmatprep.subr.bf16.mxu1 %v1564_v45  ;;  %v1522_v45 = vpack.c.bf16 %v501_v39, %v493_v38 }
  0x6b   : > { %1503 = vmatpush1.bf16.msra.mxu0 %v1502_v48  ;;  %v1524_v48 = vpack.c.bf16 %v518_v14, %v510_v41 }
  0x6c   : > { %1505 = vmatprep.subr.bf16.mxu0 %v1504_v51  ;;  %v1586_v51 = vpack.c.bf16 %v503_v44, %v495_v43 }
  0x6d   : > { %1567 = vmatpush1.bf16.msra.mxu1 %v1566_v54  ;;  %v1588_v54 = vpack.c.bf16 %v520_v47, %v512_v46 }
  0x6e   : > { %1569 = vmatprep.subr.bf16.mxu1 %v1568_v57  ;;  %v1526_v57 = vpack.c.bf16 %v517_v50, %v509_v49 }
  0x6f   : > { %1507 = vmatpush1.bf16.msra.mxu0 %v1506_v60  ;;  %v1528_v60 = vpack.c.bf16 %v534_v53, %v526_v52 }
  0x70   : > { %1509 = vmatprep.subr.bf16.mxu0 %v1508_v63  ;;  %v1590_v63 = vpack.c.bf16 %v519_v56, %v511_v55 }
  0x71   : > { %1571 = vmatpush1.bf16.msra.mxu1 %v1570_v2  ;;  %v535_v2 = vld [vmem:[%s2522_s1 + $0x7f0] sm:$0xff] }
  0x72   : > { %1573 = vmatprep.subr.bf16.mxu1 %v1572_v5  ;;  %v1594_v4 = vpack.c.bf16 %v535_v2, %v527_v1 }
  0x73   : > { %1511 = vmatpush1.bf16.msra.mxu0 %v1510_v8 }
  0x74   : > { %1513 = vmatprep.subr.bf16.mxu0 %v1512_v12 }
  0x75   : > { %1575 = vmatpush1.bf16.msra.mxu1 %v1574_v16 }
  0x76   : > { %1577 = vmatprep.subr.bf16.mxu1 %v1576_v19 }
  0x77   : > { %1515 = vmatpush1.bf16.msra.mxu0 %v1514_v22 }
  0x78   : > { %1517 = vmatprep.subr.bf16.mxu0 %v1516_v25 }
  0x79   : > { %1579 = vmatpush1.bf16.msra.mxu1 %v1578_v28 }
  0x7a   : > { %1581 = vmatprep.subr.bf16.mxu1 %v1580_v31 }
  0x7b   : > { %1519 = vmatpush1.bf16.msra.mxu0 %v1518_v34 }
  0x7c   : > { %1521 = vmatprep.subr.bf16.mxu0 %v1520_v37 }
  0x7d   : > { %1583 = vmatpush1.bf16.msra.mxu1 %v1582_v40 }
  0x7e   : > { %1585 = vmatprep.subr.bf16.mxu1 %v1584_v42 }
  0x7f   : > { %1523 = vmatpush1.bf16.msra.mxu0 %v1522_v45 }
  0x80   : > { %1525 = vmatprep.subr.bf16.mxu0 %v1524_v48 }
  0x81   : > { %1587 = vmatpush1.bf16.msra.mxu1 %v1586_v51 }
  0x82   : > { %1589 = vmatprep.subr.bf16.mxu1 %v1588_v54 }
  0x83   : > { %1527 = vmatpush1.bf16.msra.mxu0 %v1526_v57 }
  0x84   : > { %1529 = vmatprep.subr.bf16.mxu0 %v1528_v60 }
  0x85   : > { %1591 = vmatpush1.bf16.msra.mxu1 %v1590_v63 }
  0x86   : > { %1593 = vmatprep.subr.bf16.mxu1 %v1592_v0 }
  0x87   : > { %1531 = vmatpush1.bf16.msra.mxu0 %v1530_v3 }
  0x89   : > { %1595 = vmatpush1.bf16.msra.mxu1 %v1594_v4 }
  0x8a   : > { %747 = vmatmul.mubr.f32.vlgmr.msra.gmra.mrb[2].mxu0 %v1987_v10 }
  0x8c   : > { %818 = vmatmul.mubr.f32.vlgmr.msra.gmra.mrb[2].mxu1 %v1987_v10 }
 0x11d   : > { %v606_v5 = vpop.f32.mrb[0].mxu0 }
 0x11e   : > { %v845_v6 = vsel %vm844_vm0, %v606_v5, 0.0  ;;  %v608_v7 = vpop.f32.mrb[1].mxu0 }
 0x11f   : > { %v832_v8 = vcombine.low %v606_v5, %v608_v7  ;;  %v846_v9 = vsel %vm844_vm0, %v608_v7, 0.0  ;;  %864 = vmatprep.subr.mxu1 %v608_v7  ;;  %928 = vmatprep.mubr.f32.mxu1 %v608_v7  ;;  %v677_v11 = vpop.f32.mrb[0].mxu1 }
 0x120   : > { %v847_v10 = vadd.f32 %v846_v9, %v845_v6  ;;  %v848_v12 = vsel %vm844_vm0, %v677_v11, 0.0  ;;  %865 = vmatpush1.xpose.msra.mxu1 %v606_v5  ;;  %v679_v13 = vpop.f32.mrb[1].mxu1 }
 0x121   : > { %840 = vst [vmem:[%s2492_s6] sm:$0xff] %v832_v8  ;;  %v833_v15 = vcombine.low %v677_v11, %v679_v13  ;;  %v850_v16 = vsel %vm844_vm0, %v679_v13, 0.0  ;;  %934 = vmatprep.subr.mxu1 %v679_v13 }
 0x122   : > { %v849_v17 = vadd.f32 %v848_v12, %v847_v10 }
 0x123   : > { %841 = vst [vmem:[%s2492_s6 + $0x8] sm:$0xff] %v833_v15  ;;  %929 = vmatmul.mubr.f32.vlgmr.msra.gmra.mrb[4].mxu1 %v606_v5 }
 0x124   : > { %v851_v18 = vadd.f32 %v850_v16, %v849_v17  ;;  %935 = vmatpush1.xpose.msra.mxu1 %v677_v11  ;;  %998 = vmatprep.mubr.f32.mxu1 %v679_v13 }
 0x12b   : > { %999 = vmatmul.mubr.f32.vlgmr.msra.gmra.mrb[4].mxu1 %v677_v11 }
 0x15d   : > { %v748_v19 = vpop.f32.mrb[2].mxu0 }
 0x15e   : > { %v852_v20 = vsel %vm844_vm0, %v748_v19, 0.0  ;;  %v750_v21 = vpop.f32.mrb[3].mxu0 }
 0x15f   : > { %v834_v22 = vcombine.low %v748_v19, %v750_v21  ;;  %1004 = vmatprep.subr.mxu0 %v750_v21  ;;  %1068 = vmatprep.mubr.f32.mxu0 %v750_v21  ;;  %v819_v23 = vpop.f32.mrb[2].mxu1  ;;  %v853_v24 = vadd.f32 %v852_v20, %v851_v18  ;;  %v854_v25 = vsel %vm844_vm0, %v750_v21, 0.0 }
 0x160   : > { %1005 = vmatpush1.xpose.msra.mxu0 %v748_v19  ;;  %v821_v26 = vpop.f32.mrb[3].mxu1  ;;  %v856_v27 = vsel %vm844_vm0, %v819_v23, 0.0 }
 0x161   : > { %842 = vst [vmem:[%s2492_s6 + $0x10] sm:$0xff] %v834_v22  ;;  %v835_v28 = vcombine.low %v819_v23, %v821_v26  ;;  %1074 = vmatprep.subr.mxu0 %v821_v26  ;;  %v855_v29 = vadd.f32 %v854_v25, %v853_v24  ;;  %v858_v30 = vsel %vm844_vm0, %v821_v26, 0.0 }
 0x163   : > { %843 = vst [vmem:[%s2492_s6 + $0x18] sm:$0xff] %v835_v28  ;;  %1069 = vmatmul.mubr.f32.vlgmr.msra.gmra.mrb[4].mxu0 %v748_v19  ;;  %v857_v31 = vadd.f32 %v856_v27, %v855_v29 }
 0x164   : > { %1075 = vmatpush1.xpose.msra.mxu0 %v819_v23  ;;  %1138 = vmatprep.mubr.f32.mxu0 %v821_v26 }
 0x165   : > { %v859_v32 = vadd.f32 %v858_v30, %v857_v31 }
 0x167   : > { %860 = vadd.xlane.f32.xlu0 %v859_v32 }
 0x16b   : > { %1139 = vmatmul.mubr.f32.vlgmr.msra.gmra.mrb[4].mxu0 %v819_v23 }
 0x1f4   : > { %v861_v33 = vpop.xlane.xlu0 %860 }
 0x1f5   : > { %863 = vst.msk [vmem:[%s272_s10] sm:$0xf] %vm862_vm1, %v861_v33 }
 0x1fe   : > { %v1000_v34 = vpop.f32.mrb[4].mxu1 }
 0x1ff   : > { %v1002_v35 = vpop.f32.mrb[5].mxu1 }
 0x23e   : > { %v1140_v36 = vpop.f32.mrb[4].mxu0 }
 0x23f   : > { %v1596_v37 = vadd.f32 %v1140_v36, %v1000_v34  ;;  %v1142_v38 = vpop.f32.mrb[5].mxu0 }
 0x241   : > { %1145 = vst.msk [vmem:[%s279_s13] sm:$0xf] %vm1144_vm2, %v1596_v37 }
 0x242 PF: > { %s15_s17 = sadd.s32 1, %s1648_s17   ;;  %s2526_s15 = smov %s1644_s16 }
 0x243   : > { %p12_p5 = scmp.ge.s32.totalorder %s15_s17, 4   ;;  %s2527_s16 = smov %s2529_s18 }
 0x245   :  { %14 = sbr.rel (!%p12_p5) target bundleno = 2 (0x2), region = 85 }

</bundles_post_ra>
